<compile_context>
chip_gen: v6e
topology: v6e:2x2x1
jax: 0.10.0
libtpu: 0.0.40
codegen_flags: <defaults>
</compile_context>

<pallas_src>
from functools import partial

import jax
import jax.numpy as jnp
from jax.experimental import pallas as pl
from jax.experimental.pallas import tpu as pltpu


def rnn_kernel(x_ref, wih_ref, whh_ref, bias_ref, wlin_ref, blin_ref, out_ref,
               *, seq_len):
    """Single-invocation Elman RNN + ReLU + Linear.

    x_ref    : (T*B, Dp)   time-major flattened input, K zero-padded to 256
    wih_ref  : (Dp, H)     W_ih^T (rows 189..255 are zero)
    whh_ref  : (H, H)      W_hh^T
    bias_ref : (1, H)      b_ih + b_hh (fused)
    wlin_ref : (H, Op)     W_lin^T, output lanes zero-padded to 128
    blin_ref : (1, Op)     b_lin, zero-padded to 128
    out_ref  : (B, Op)     lane-dense output slab; real logits live in [:, :2]
    """
    TB = x_ref.shape[0]
    B = TB // seq_len

    # Prologue: one MXU call projects every timestep; both recurrent biases folded in.
    # K is padded to 256 -> two clean 128-deep MXU passes, unmasked loads.
    xp = (jnp.dot(x_ref[...], wih_ref[...], preferred_element_type=jnp.float32)
          + bias_ref[...])                                   # (T*B, H)

    whh = whh_ref[...]                                       # (H, H), load once

    # Recurrence, fully unrolled at trace time (T small & static).  h stays
    # vreg-resident; slices are static and sublane-aligned.
    # t = 0: h0 is all-zeros, so the recurrent matmul is skipped entirely.
    h = jnp.tanh(xp[0:B, :])
    for t in range(1, seq_len):
        h = jnp.tanh(xp[t * B:(t + 1) * B, :]
                     + jnp.dot(h, whh, preferred_element_type=jnp.float32))

    # Epilogue: relu(h_n) -> Linear into a 128-lane slab (unmasked store).
    h_relu = jnp.maximum(h, 0.0)
    out_ref[...] = (jnp.dot(h_relu, wlin_ref[...],
                            preferred_element_type=jnp.float32)
                    + blin_ref[...])


def rnn_forward(x_bt, params):
    """x_bt: (B, T, 189) float32 (batch-first, like PyTorch). Returns (1, B, 2)."""
    w_ih, w_hh, b_ih, b_hh, w_lin, b_lin = params
    B, T, D_in = x_bt.shape
    H = w_hh.shape[0]
    O = w_lin.shape[0]

    # Pad batch to a multiple of 8 (sublane width) so vregs / MXU rows are denser.
    B_pad = ((B + 7) // 8) * 8
    # Pad K (189) to a multiple of 128 -> clean MXU passes, unmasked vector loads.
    D_pad = ((D_in + 127) // 128) * 128
    # Pad output lanes (2) to 128 -> unmasked epilogue store.
    O_pad = 128

    x_tbd = jnp.transpose(x_bt, (1, 0, 2))                   # (T, B, D) time-major
    x_tbd = jnp.pad(x_tbd, ((0, 0), (0, B_pad - B), (0, D_pad - D_in)))
    x_flat = x_tbd.reshape(T * B_pad, D_pad)                 # (T*B_pad, D_pad)

    # Pre-transpose / zero-pad weights so the kernel does (rows, in) @ (in, out).
    w_ih_t = jnp.pad(jnp.transpose(w_ih), ((0, D_pad - D_in), (0, 0)))   # (D_pad, H)
    w_hh_t = jnp.transpose(w_hh)                                         # (H, H)
    w_lin_t = jnp.pad(jnp.transpose(w_lin), ((0, 0), (0, O_pad - O)))    # (H, O_pad)
    bias = (b_ih + b_hh).reshape(1, H)                                   # fused bias
    b_lin2 = jnp.pad(b_lin.reshape(1, O), ((0, 0), (0, O_pad - O)))      # (1, O_pad)

    vmem = pl.BlockSpec(memory_space=pltpu.MemorySpace.VMEM)  # whole array, VMEM-resident

    out = pl.pallas_call(
        partial(rnn_kernel, seq_len=T),
        out_shape=jax.ShapeDtypeStruct((B_pad, O_pad), jnp.float32),
        # No grid: everything (~0.2 MiB total) fits trivially in VMEM on v5e/v6e/v7x,
        # so the kernel runs as a single invocation with an in-kernel time loop.
        in_specs=[vmem, vmem, vmem, vmem, vmem, vmem],
        out_specs=vmem,
    )(x_flat, w_ih_t, w_hh_t, bias, w_lin_t, b_lin2)

    return out[None, :B, :O]                                  # (1, B, 2), matches PyTorch


def reference_forward(x_bt, params):
    """Pure-JAX reference matching PyTorch semantics."""
    w_ih, w_hh, b_ih, b_hh, w_lin, b_lin = params
    B, T, _ = x_bt.shape
    H = w_hh.shape[0]

    def step(h, x_t):
        h_new = jnp.tanh(x_t @ w_ih.T + b_ih + h @ w_hh.T + b_hh)
        return h_new, h_new

    h0 = jnp.zeros((B, H), jnp.float32)
    h_n, _ = jax.lax.scan(step, h0, jnp.transpose(x_bt, (1, 0, 2)))
    h_relu = jnp.maximum(h_n, 0.0)
    return (h_relu @ w_lin.T + b_lin)[None, :, :]


def init_params(key, d_in=189, hidden=64, out=2):
    # PyTorch-style uniform(-1/sqrt(hidden), 1/sqrt(hidden)) init, deterministic.
    ks = jax.random.split(key, 6)
    bound = 1.0 / jnp.sqrt(hidden)
    w_ih = jax.random.uniform(ks[0], (hidden, d_in), jnp.float32, -bound, bound)
    w_hh = jax.random.uniform(ks[1], (hidden, hidden), jnp.float32, -bound, bound)
    b_ih = jax.random.uniform(ks[2], (hidden,), jnp.float32, -bound, bound)
    b_hh = jax.random.uniform(ks[3], (hidden,), jnp.float32, -bound, bound)
    w_lin = jax.random.uniform(ks[4], (out, hidden), jnp.float32, -bound, bound)
    b_lin = jax.random.uniform(ks[5], (out,), jnp.float32, -bound, bound)
    return (w_ih, w_hh, b_ih, b_hh, w_lin, b_lin)


if __name__ == "__main__":
    key = jax.random.PRNGKey(0)
    k_p, k_x = jax.random.split(key)
    params = init_params(k_p)

    B, T, D_in = 2, 8, 189
    x = jax.random.normal(k_x, (B, T, D_in), jnp.float32)

    out = rnn_forward(x, params)
    out = jax.block_until_ready(out)

    ref = reference_forward(x, params)
    assert out.shape == (1, B, 2), out.shape
    assert jnp.allclose(out, ref, atol=1e-5, rtol=1e-5), float(
        jnp.max(jnp.abs(out - ref)))

    print("KERNEL_OK")
</pallas_src>

<mosaic_0001>
module attributes {stable_mosaic.version = 11 : i64} {
  func.func @rnn_kernel(%arg0: memref<64x256xf32, #tpu.memory_space<vmem>>, %arg1: memref<256x64xf32, #tpu.memory_space<vmem>>, %arg2: memref<64x64xf32, #tpu.memory_space<vmem>>, %arg3: memref<1x64xf32, #tpu.memory_space<vmem>>, %arg4: memref<64x128xf32, #tpu.memory_space<vmem>>, %arg5: memref<1x128xf32, #tpu.memory_space<vmem>>, %arg6: memref<8x128xf32, #tpu.memory_space<vmem>>) attributes {dimension_semantics = [], scalar_prefetch = 0 : i64, scratch_operands = 0 : i64, tpu.core_type = #tpu.core_type<tc>} {
    %c0 = arith.constant 0 : index
    %c0_0 = arith.constant 0 : index
    %0 = vector.load %arg0[%c0, %c0_0] : memref<64x256xf32, #tpu.memory_space<vmem>>, vector<64x256xf32>
    %c0_1 = arith.constant 0 : index
    %c0_2 = arith.constant 0 : index
    %1 = vector.load %arg1[%c0_1, %c0_2] : memref<256x64xf32, #tpu.memory_space<vmem>>, vector<256x64xf32>
    %cst = arith.constant dense<0.000000e+00> : vector<64x64xf32>
    %2 = tpu.matmul %0, %1, %cst {dimension_numbers = #tpu.dot_dimension_numbers<[1], [0], [0], [1], [0, 0, 1, 1], [], []>} : vector<64x256xf32>, vector<256x64xf32>, vector<64x64xf32> -> vector<64x64xf32>
    %c0_3 = arith.constant 0 : index
    %c0_4 = arith.constant 0 : index
    %3 = vector.load %arg3[%c0_3, %c0_4] : memref<1x64xf32, #tpu.memory_space<vmem>>, vector<1x64xf32>
    %4 = vector.broadcast %3 : vector<1x64xf32> to vector<64x64xf32>
    %5 = arith.addf %2, %4 : vector<64x64xf32>
    %c0_5 = arith.constant 0 : index
    %c0_6 = arith.constant 0 : index
    %6 = vector.load %arg2[%c0_5, %c0_6] : memref<64x64xf32, #tpu.memory_space<vmem>>, vector<64x64xf32>
    %7 = vector.extract_strided_slice %5 {offsets = [0, 0], sizes = [8, 64], strides = [1, 1]} : vector<64x64xf32> to vector<8x64xf32>
    %8 = math.tanh %7 : vector<8x64xf32>
    %9 = vector.extract_strided_slice %5 {offsets = [8, 0], sizes = [8, 64], strides = [1, 1]} : vector<64x64xf32> to vector<8x64xf32>
    %cst_7 = arith.constant dense<0.000000e+00> : vector<8x64xf32>
    %10 = tpu.matmul %8, %6, %cst_7 {dimension_numbers = #tpu.dot_dimension_numbers<[1], [0], [0], [1], [0, 0, 1, 1], [], []>} : vector<8x64xf32>, vector<64x64xf32>, vector<8x64xf32> -> vector<8x64xf32>
    %11 = arith.addf %9, %10 : vector<8x64xf32>
    %12 = math.tanh %11 : vector<8x64xf32>
    %13 = vector.extract_strided_slice %5 {offsets = [16, 0], sizes = [8, 64], strides = [1, 1]} : vector<64x64xf32> to vector<8x64xf32>
    %cst_8 = arith.constant dense<0.000000e+00> : vector<8x64xf32>
    %14 = tpu.matmul %12, %6, %cst_8 {dimension_numbers = #tpu.dot_dimension_numbers<[1], [0], [0], [1], [0, 0, 1, 1], [], []>} : vector<8x64xf32>, vector<64x64xf32>, vector<8x64xf32> -> vector<8x64xf32>
    %15 = arith.addf %13, %14 : vector<8x64xf32>
    %16 = math.tanh %15 : vector<8x64xf32>
    %17 = vector.extract_strided_slice %5 {offsets = [24, 0], sizes = [8, 64], strides = [1, 1]} : vector<64x64xf32> to vector<8x64xf32>
    %cst_9 = arith.constant dense<0.000000e+00> : vector<8x64xf32>
    %18 = tpu.matmul %16, %6, %cst_9 {dimension_numbers = #tpu.dot_dimension_numbers<[1], [0], [0], [1], [0, 0, 1, 1], [], []>} : vector<8x64xf32>, vector<64x64xf32>, vector<8x64xf32> -> vector<8x64xf32>
    %19 = arith.addf %17, %18 : vector<8x64xf32>
    %20 = math.tanh %19 : vector<8x64xf32>
    %21 = vector.extract_strided_slice %5 {offsets = [32, 0], sizes = [8, 64], strides = [1, 1]} : vector<64x64xf32> to vector<8x64xf32>
    %cst_10 = arith.constant dense<0.000000e+00> : vector<8x64xf32>
    %22 = tpu.matmul %20, %6, %cst_10 {dimension_numbers = #tpu.dot_dimension_numbers<[1], [0], [0], [1], [0, 0, 1, 1], [], []>} : vector<8x64xf32>, vector<64x64xf32>, vector<8x64xf32> -> vector<8x64xf32>
    %23 = arith.addf %21, %22 : vector<8x64xf32>
    %24 = math.tanh %23 : vector<8x64xf32>
    %25 = vector.extract_strided_slice %5 {offsets = [40, 0], sizes = [8, 64], strides = [1, 1]} : vector<64x64xf32> to vector<8x64xf32>
    %cst_11 = arith.constant dense<0.000000e+00> : vector<8x64xf32>
    %26 = tpu.matmul %24, %6, %cst_11 {dimension_numbers = #tpu.dot_dimension_numbers<[1], [0], [0], [1], [0, 0, 1, 1], [], []>} : vector<8x64xf32>, vector<64x64xf32>, vector<8x64xf32> -> vector<8x64xf32>
    %27 = arith.addf %25, %26 : vector<8x64xf32>
    %28 = math.tanh %27 : vector<8x64xf32>
    %29 = vector.extract_strided_slice %5 {offsets = [48, 0], sizes = [8, 64], strides = [1, 1]} : vector<64x64xf32> to vector<8x64xf32>
    %cst_12 = arith.constant dense<0.000000e+00> : vector<8x64xf32>
    %30 = tpu.matmul %28, %6, %cst_12 {dimension_numbers = #tpu.dot_dimension_numbers<[1], [0], [0], [1], [0, 0, 1, 1], [], []>} : vector<8x64xf32>, vector<64x64xf32>, vector<8x64xf32> -> vector<8x64xf32>
    %31 = arith.addf %29, %30 : vector<8x64xf32>
    %32 = math.tanh %31 : vector<8x64xf32>
    %33 = vector.extract_strided_slice %5 {offsets = [56, 0], sizes = [8, 64], strides = [1, 1]} : vector<64x64xf32> to vector<8x64xf32>
    %cst_13 = arith.constant dense<0.000000e+00> : vector<8x64xf32>
    %34 = tpu.matmul %32, %6, %cst_13 {dimension_numbers = #tpu.dot_dimension_numbers<[1], [0], [0], [1], [0, 0, 1, 1], [], []>} : vector<8x64xf32>, vector<64x64xf32>, vector<8x64xf32> -> vector<8x64xf32>
    %35 = arith.addf %33, %34 : vector<8x64xf32>
    %36 = math.tanh %35 : vector<8x64xf32>
    %cst_14 = arith.constant 0.000000e+00 : f32
    %37 = vector.broadcast %cst_14 : f32 to vector<8x64xf32>
    %38 = arith.maximumf %36, %37 : vector<8x64xf32>
    %c0_15 = arith.constant 0 : index
    %c0_16 = arith.constant 0 : index
    %39 = vector.load %arg4[%c0_15, %c0_16] : memref<64x128xf32, #tpu.memory_space<vmem>>, vector<64x128xf32>
    %cst_17 = arith.constant dense<0.000000e+00> : vector<8x128xf32>
    %40 = tpu.matmul %38, %39, %cst_17 {dimension_numbers = #tpu.dot_dimension_numbers<[1], [0], [0], [1], [0, 0, 1, 1], [], []>} : vector<8x64xf32>, vector<64x128xf32>, vector<8x128xf32> -> vector<8x128xf32>
    %c0_18 = arith.constant 0 : index
    %c0_19 = arith.constant 0 : index
    %41 = vector.load %arg5[%c0_18, %c0_19] : memref<1x128xf32, #tpu.memory_space<vmem>>, vector<1x128xf32>
    %42 = vector.broadcast %41 : vector<1x128xf32> to vector<8x128xf32>
    %43 = arith.addf %40, %42 : vector<8x128xf32>
    %c0_20 = arith.constant 0 : index
    %c0_21 = arith.constant 0 : index
    %44 = vector.load %arg6[%c0_20, %c0_21] : memref<8x128xf32, #tpu.memory_space<vmem>>, vector<8x128xf32>
    tpu.vector_store %arg6[%c0_20, %c0_21], %43 {strides = array<i32>} : memref<8x128xf32, #tpu.memory_space<vmem>>, vector<8x128xf32>,
    return
  }
}

</mosaic_0001>

<bundles_post_ra>
// kernel: tpu_custom_call.1
= control target key start
LH: loop header
LB: loop body
LE: loop exit
PB: predicated region body
PF: predicated region fallthrough
CT: control target
= control target key end

     0   :  { %s1566_s0 = inlined_call_operand.vmem [shape: f32[64,256], index: 0, kind: input, shape index: {}]   ;;  %s1567_s1 = inlined_call_operand.vmem [shape: f32[256,64], index: 1, kind: input, shape index: {}]   ;;  %s1568_s2 = inlined_call_operand.vmem [shape: f32[64,64], index: 2, kind: input, shape index: {}]   ;;  %s1569_s3 = inlined_call_operand.vmem [shape: f32[1,64], index: 3, kind: input, shape index: {}]   ;;  %s1570_s4 = inlined_call_operand.vmem [shape: f32[64,128], index: 4, kind: input, shape index: {}]   ;;  %s1571_s5 = inlined_call_operand.vmem [shape: f32[1,128], index: 5, kind: input, shape index: {}]   ;;  %s1572_s6 = inlined_call_operand.hbm [shape: f32[8,128], index: 6, kind: output, shape index: {}]  }
   0x1   :  { %v71_v0 = vld [vmem:[%s1567_s1 + $0xf8] sm:$0xff]  ;;  %v70_v2 = vld [vmem:[%s1567_s1 + $0xf0] sm:$0xff]  ;;  %v69_v4 = vld [vmem:[%s1567_s1 + $0xe8] sm:$0xff] }
   0x2   :  { %v55_v1 = vld [vmem:[%s1567_s1 + $0x78] sm:$0xff]  ;;  %833 = vmatprep.subr.mxu0 %v71_v0  ;;  %v54_v3 = vld [vmem:[%s1567_s1 + $0x70] sm:$0xff]  ;;  %v53_v5 = vld [vmem:[%s1567_s1 + $0x68] sm:$0xff] }
   0x3   :  { %834 = vmatpush3.msra.mxu0 %v55_v1  ;;  %v68_v6 = vld [vmem:[%s1567_s1 + $0xe0] sm:$0xff]  ;;  %v67_v8 = vld [vmem:[%s1567_s1 + $0xd8] sm:$0xff]  ;;  %v66_v10 = vld [vmem:[%s1567_s1 + $0xd0] sm:$0xff] }
   0x4   :  { %835 = vmatprep.subr.mxu0 %v70_v2  ;;  %v52_v7 = vld [vmem:[%s1567_s1 + $0x60] sm:$0xff]  ;;  %v51_v9 = vld [vmem:[%s1567_s1 + $0x58] sm:$0xff]  ;;  %v50_v11 = vld [vmem:[%s1567_s1 + $0x50] sm:$0xff] }
   0x5   :  { %836 = vmatpush3.msra.mxu0 %v54_v3  ;;  %v65_v12 = vld [vmem:[%s1567_s1 + $0xc8] sm:$0xff] }
   0x6   :  { %837 = vmatprep.subr.mxu0 %v69_v4  ;;  %v25_v13 = vld [vmem:[%s1566_s0 + $0x8] sm:$0xff] }
   0x7   :  { %838 = vmatpush3.msra.mxu0 %v53_v5  ;;  %v49_v14 = vld [vmem:[%s1567_s1 + $0x48] sm:$0xff]  ;;  %143 = vmatprep.mubr.f32.mxu0 %v25_v13 }
   0x8   :  { %839 = vmatprep.subr.mxu0 %v68_v6 }
   0x9   :  { %840 = vmatpush3.msra.mxu0 %v52_v7 }
   0xa   :  { %841 = vmatprep.subr.mxu0 %v67_v8 }
   0xb   :  { %842 = vmatpush3.msra.mxu0 %v51_v9 }
   0xc   :  { %843 = vmatprep.subr.mxu0 %v66_v10 }
   0xd   :  { %11 = vsyncpa [#allocation3], 0  ;;  %844 = vmatpush3.msra.mxu0 %v50_v11  ;;  %v64_v15 = vld [vmem:[%s1567_s1 + $0xc0] sm:$0xff]  ;;  %v63_v17 = vld [vmem:[%s1567_s1 + $0xb8] sm:$0xff]  ;;  %v1154_v34 = vmov 0.0   ;;  %vm1155_vm0 = vmmov 0  }
   0xe   :  { %845 = vmatprep.subr.mxu0 %v65_v12  ;;  %v48_v16 = vld [vmem:[%s1567_s1 + $0x40] sm:$0xff]  ;;  %v47_v18 = vld [vmem:[%s1567_s1 + $0x38] sm:$0xff]  ;;  %v62_v19 = vld [vmem:[%s1567_s1 + $0xb0] sm:$0xff]  ;;  %961 = vmatprep.subr.mxu1 %v1154_v34  ;;  %vm193_vm1 = vcmask 523264   ;;  %s1156_s25 = smov [#allocation2]  }
   0xf   :  { %846 = vmatpush3.msra.mxu0 %v49_v14  ;;  %v46_v20 = vld [vmem:[%s1567_s1 + $0x30] sm:$0xff]  ;;  %v61_v21 = vld [vmem:[%s1567_s1 + $0xa8] sm:$0xff]  ;;  %v60_v23 = vld [vmem:[%s1567_s1 + $0xa0] sm:$0xff]  ;;  %977 = vmatprep.mubr.msk.f32.mxu1 %vm1155_vm0, %v1154_v34  ;;  %s815_s26 = sshll.u32 %s1156_s25, 4  ;;  %s816_s26 = int_to_ptr.vmem [resolvable:$true] %s815_s26 }
  0x10   :  { %847 = vmatprep.subr.mxu0 %v64_v15  ;;  %v45_v22 = vld [vmem:[%s1567_s1 + $0x28] sm:$0xff]  ;;  %v44_v24 = vld [vmem:[%s1567_s1 + $0x20] sm:$0xff]  ;;  %v59_v25 = vld [vmem:[%s1567_s1 + $0x98] sm:$0xff]  ;;  %p1137_p1 = scmp.lt.s32.totalorder %s816_s26, %s816_s26 }
  0x11   :  { %848 = vmatpush3.msra.mxu0 %v48_v16  ;;  %v43_v26 = vld [vmem:[%s1567_s1 + $0x18] sm:$0xff]  ;;  %v58_v27 = vld [vmem:[%s1567_s1 + $0x90] sm:$0xff]  ;;  %v57_v29 = vld [vmem:[%s1567_s1 + $0x88] sm:$0xff] }
  0x12   :  { %849 = vmatprep.subr.mxu0 %v63_v17  ;;  %v42_v28 = vld [vmem:[%s1567_s1 + $0x10] sm:$0xff]  ;;  %v41_v30 = vld [vmem:[%s1567_s1 + $0x8] sm:$0xff]  ;;  %v56_v31 = vld [vmem:[%s1567_s1 + $0x80] sm:$0xff] }
  0x13   :  { %850 = vmatpush3.msra.mxu0 %v47_v18  ;;  %v40_v32 = vld [vmem:[%s1567_s1] sm:$0xff]  ;;  %v1298_v35 = vld [vmem:[%s1568_s2 + $0x38] sm:$0xff]  ;;  %v1307_v36 = vld [vmem:[%s1568_s2 + $0x30] sm:$0xff] }
  0x14   :  { %851 = vmatprep.subr.mxu0 %v62_v19  ;;  %v24_v33 = vld [vmem:[%s1566_s0] sm:$0xff]  ;;  %962 = vmatpush3.msra.mxu1 %v1298_v35  ;;  %v1312_v37 = vld [vmem:[%s1568_s2 + $0x28] sm:$0xff]  ;;  %v27_v38 = vld [vmem:[%s1566_s0 + $0x18] sm:$0xff] }
  0x15   :  { %852 = vmatpush3.msra.mxu0 %v46_v20  ;;  %963 = vmatprep.subr.mxu1 %v1154_v34  ;;  %v26_v39 = vld [vmem:[%s1566_s0 + $0x10] sm:$0xff]  ;;  %v1326_v40 = vld [vmem:[%s1568_s2 + $0x20] sm:$0xff]  ;;  %v1335_v41 = vld [vmem:[%s1568_s2 + $0x18] sm:$0xff] }
  0x16   :  { %853 = vmatprep.subr.mxu0 %v61_v21  ;;  %964 = vmatpush3.msra.mxu1 %v1307_v36  ;;  %v1344_v42 = vld [vmem:[%s1568_s2 + $0x10] sm:$0xff]  ;;  %v1353_v43 = vld [vmem:[%s1568_s2 + $0x8] sm:$0xff]  ;;  %v1362_v44 = vld [vmem:[%s1568_s2] sm:$0xff] }
  0x17   :  { %854 = vmatpush3.msra.mxu0 %v45_v22  ;;  %965 = vmatprep.subr.mxu1 %v1154_v34  ;;  %v1379_v46 = vld [vmem:[%s1569_s3] ss:$0 sm:$0xff]  ;;  %v29_v51 = vld [vmem:[%s1566_s0 + $0x28] sm:$0xff]  ;;  %v31_v61 = vld [vmem:[%s1566_s0 + $0x38] sm:$0xff] }
  0x18   :  { %855 = vmatprep.subr.mxu0 %v60_v23  ;;  %966 = vmatpush3.msra.mxu1 %v1312_v37  ;;  %v28_v52 = vld [vmem:[%s1566_s0 + $0x20] sm:$0xff]  ;;  %v30_v62 = vld [vmem:[%s1566_s0 + $0x30] sm:$0xff]  ;;  %v33_v63 = vld [vmem:[%s1566_s0 + $0x48] sm:$0xff] }
  0x19   :  { %856 = vmatpush3.msra.mxu0 %v44_v24  ;;  %967 = vmatprep.subr.mxu1 %v1154_v34  ;;  %v32_v0 = vld [vmem:[%s1566_s0 + $0x40] sm:$0xff]  ;;  %v35_v9 = vld [vmem:[%s1566_s0 + $0x58] sm:$0xff]  ;;  %v34_v10 = vld [vmem:[%s1566_s0 + $0x50] sm:$0xff] }
  0x1a   :  { %857 = vmatprep.subr.mxu0 %v59_v25  ;;  %968 = vmatpush3.msra.mxu1 %v1326_v40  ;;  %v37_v11 = vld [vmem:[%s1566_s0 + $0x68] sm:$0xff]  ;;  %v36_v12 = vld [vmem:[%s1566_s0 + $0x60] sm:$0xff]  ;;  %v39_v13 = vld [vmem:[%s1566_s0 + $0x78] sm:$0xff] }
  0x1b   :  { %858 = vmatpush3.msra.mxu0 %v43_v26  ;;  %969 = vmatprep.subr.mxu1 %v1154_v34  ;;  %v38_v14 = vld [vmem:[%s1566_s0 + $0x70] sm:$0xff] }
  0x1c   :  { %859 = vmatprep.subr.mxu0 %v58_v27  ;;  %970 = vmatpush3.msra.mxu1 %v1335_v41 }
  0x1d   :  { %860 = vmatpush3.msra.mxu0 %v42_v28  ;;  %971 = vmatprep.subr.mxu1 %v1154_v34 }
  0x1e   :  { %861 = vmatprep.subr.mxu0 %v57_v29  ;;  %972 = vmatpush3.msra.mxu1 %v1344_v42 }
  0x1f   :  { %862 = vmatpush3.msra.mxu0 %v41_v30  ;;  %973 = vmatprep.subr.mxu1 %v1154_v34 }
  0x20   :  { %863 = vmatprep.subr.mxu0 %v56_v31  ;;  %974 = vmatpush3.msra.mxu1 %v1353_v43 }
  0x21   :  { %864 = vmatpush3.msra.mxu0 %v40_v32  ;;  %975 = vmatprep.subr.mxu1 %v1154_v34 }
  0x22   :  { %144 = vmatmul.mubr.f32.vlgmr.msra.gmra.mxu0 %v24_v33  ;;  %1018 = vmatprep.subr.mxu0 %v1154_v34 }
  0x23   :  { %1019 = vmatpush3.msra.mxu0 %v1298_v35  ;;  %148 = vmatprep.mubr.f32.mxu0 %v27_v38 }
  0x24   :  { %1020 = vmatprep.subr.mxu0 %v1154_v34  ;;  %976 = vmatpush3.msra.mxu1 %v1362_v44 }
  0x25   :  { %1021 = vmatpush3.msra.mxu0 %v1307_v36  ;;  %980 = vmatprep.subr.mxu1 %v1154_v34 }
  0x26   :  { %149 = vmatmul.mubr.f32.gmra.mxu0 %v26_v39  ;;  %1022 = vmatprep.subr.mxu0 %v1154_v34 }
  0x27   :  { %1023 = vmatpush3.msra.mxu0 %v1312_v37  ;;  %153 = vmatprep.mubr.f32.mxu0 %v29_v51 }
  0x28   :  { %1024 = vmatprep.subr.mxu0 %v1154_v34 }
  0x29   :  { %1025 = vmatpush3.msra.mxu0 %v1326_v40 }
  0x2a   :  { %1026 = vmatprep.subr.mxu0 %v1154_v34  ;;  %154 = vmatmul.mubr.f32.gmra.mxu0 %v28_v52  ;;  %v726_v52 = vld [vmem:[%s1570_s4 + $0x30] sm:$0xff] }
  0x2b   :  { %1027 = vmatpush3.msra.mxu0 %v1335_v41  ;;  %158 = vmatprep.mubr.f32.mxu0 %v31_v61 }
  0x2c   :  { %1028 = vmatprep.subr.mxu0 %v1154_v34 }
  0x2d   :  { %1029 = vmatpush3.msra.mxu0 %v1344_v42 }
  0x2e   :  { %1030 = vmatprep.subr.mxu0 %v1154_v34  ;;  %159 = vmatmul.mubr.f32.gmra.mxu0 %v30_v62 }
  0x2f   :  { %1031 = vmatpush3.msra.mxu0 %v1353_v43  ;;  %163 = vmatprep.mubr.f32.mxu0 %v33_v63 }
  0x30   :  { %1032 = vmatprep.subr.mxu0 %v1154_v34 }
  0x31   :  { %1033 = vmatpush3.msra.mxu0 %v1362_v44 }
  0x32   :  { %1056 = vmatprep.subr.mxu0 %v1154_v34  ;;  %164 = vmatmul.mubr.f32.gmra.mxu0 %v32_v0 }
  0x33   :  { %168 = vmatprep.mubr.f32.mxu0 %v35_v9 }
  0x36   :  { %169 = vmatmul.mubr.f32.gmra.mxu0 %v34_v10 }
  0x37   :  { %173 = vmatprep.mubr.f32.mxu0 %v37_v11 }
  0x3a   :  { %174 = vmatmul.mubr.f32.gmra.mxu0 %v36_v12 }
  0x3b   :  { %178 = vmatprep.mubr.f32.mxu0 %v39_v13 }
  0x3e   :  { %179 = vmatmul.mubr.f32.gmra.mxu0 %v38_v14 }
  0x3f   :  { %1034 = vmatprep.mubr.msk.f32.mxu0 %vm1155_vm0, %v1154_v34 }
  0xe2   :  { %v865_v45 = vpop.f32.mrf.mxu0 }
  0xe4   :  { %v866_v47 = vpop.f32.mrf.mxu0 }
  0xe5   :  { %v867_v48 = vadd.f32 %v866_v47, %v865_v45 }
  0xe6   :  { %v868_v53 = vpop.f32.mrf.mxu0 }
  0xe7   :  { %v146_v49 = vadd.f32 %v867_v48, %v1379_v46 }
  0xe8   :  { %v869_v54 = vpop.f32.mrf.mxu0 }
  0xe9   :  { %1116 = vtanh.f32 %v146_v49  ;;  %v870_v55 = vadd.f32 %v869_v54, %v868_v53  ;;  %v725_v53 = vld [vmem:[%s1570_s4 + $0x28] sm:$0xff]  ;;  %v724_v54 = vld [vmem:[%s1570_s4 + $0x20] sm:$0xff] }
  0xea   :  { %v871_v1 = vpop.f32.mrf.mxu0 }
  0xeb   :  { %v151_v56 = vadd.f32 %v870_v55, %v1379_v46  ;;  %v723_v55 = vld [vmem:[%s1570_s4 + $0x18] sm:$0xff] }
  0xec   :  { %v872_v2 = vpop.f32.mrf.mxu0 }
  0xed   :  { %v873_v3 = vadd.f32 %v872_v2, %v871_v1 }
  0xee   :  { %v874_v15 = vpop.f32.mrf.mxu0 }
  0xef   :  { %v156_v4 = vadd.f32 %v873_v3, %v1379_v46 }
  0xf0   :  { %v875_v16 = vpop.f32.mrf.mxu0 }
  0xf1   :  { %v876_v17 = vadd.f32 %v875_v16, %v874_v15 }
  0xf2   :  { %v877_v23 = vpop.f32.mrf.mxu0 }
  0xf3   :  { %v161_v18 = vadd.f32 %v876_v17, %v1379_v46 }
  0xf4   :  { %v878_v24 = vpop.f32.mrf.mxu0 }
  0xf5   :  { %v879_v32 = vadd.f32 %v878_v24, %v877_v23 }
  0xf6   :  { %v1117_v50 = vpop.eup %1116  ;;  %v880_v25 = vpop.f32.mrf.mxu0 }
  0xf7   :  { %978 = vmatmul.mubr.msk.f32.vlgmr.msra.gmra.mxu1 %vm193_vm1, %v1117_v50  ;;  %v166_v38 = vadd.f32 %v879_v32, %v1379_v46 }
  0xf8   :  { %981 = vmatpush3.msra.mxu1 %v1298_v35  ;;  %996 = vmatprep.mubr.msk.f32.mxu1 %vm1155_vm0, %v1154_v34  ;;  %v881_v26 = vpop.f32.mrf.mxu0 }
  0xf9   :  { %982 = vmatprep.subr.mxu1 %v1154_v34  ;;  %v882_v27 = vadd.f32 %v881_v26, %v880_v25 }
  0xfa   :  { %983 = vmatpush3.msra.mxu1 %v1307_v36  ;;  %v883_v28 = vpop.f32.mrf.mxu0 }
  0xfb   :  { %984 = vmatprep.subr.mxu1 %v1154_v34 }
  0xfc   :  { %985 = vmatpush3.msra.mxu1 %v1312_v37  ;;  %v884_v29 = vpop.f32.mrf.mxu0 }
  0xfd   :  { %986 = vmatprep.subr.mxu1 %v1154_v34  ;;  %v885_v30 = vadd.f32 %v884_v29, %v883_v28 }
  0xfe   :  { %987 = vmatpush3.msra.mxu1 %v1326_v40  ;;  %v1499_v31 = vpop.f32.mrf.mxu0 }
  0xff   :  { %988 = vmatprep.subr.mxu1 %v1154_v34 }
 0x100   :  { %989 = vmatpush3.msra.mxu1 %v1335_v41  ;;  %v887_v33 = vpop.f32.mrf.mxu0 }
 0x101   :  { %990 = vmatprep.subr.mxu1 %v1154_v34 }
 0x102   :  { %991 = vmatpush3.msra.mxu1 %v1344_v42 }
 0x103   :  { %992 = vmatprep.subr.mxu1 %v1154_v34 }
 0x104   :  { %993 = vmatpush3.msra.mxu1 %v1353_v43 }
 0x105   :  { %994 = vmatprep.subr.mxu1 %v1154_v34 }
 0x106   :  { %995 = vmatpush3.msra.mxu1 %v1362_v44 }
 0x107   :  { %999 = vmatprep.subr.mxu1 %v1154_v34 }
 0x1b7   :  { %v263_v57 = vpop.f32.mrf.mxu1 }
 0x1b8   :  { %v267_v58 = vadd.f32 %v263_v57, %v151_v56  ;;  %v722_v56 = vld [vmem:[%s1570_s4 + $0x10] sm:$0xff]  ;;  %v721_v57 = vld [vmem:[%s1570_s4 + $0x8] sm:$0xff] }
 0x1b9   :  { %v979_v59 = vpop.f32.mrf.mxu1 }
 0x1ba   :  { %1118 = vtanh.f32 %v267_v58  ;;  %v720_v58 = vld [vmem:[%s1570_s4] sm:$0xff]  ;;  %v888_v59 = vadd.f32 %v887_v33, %v1499_v31 }
 0x1c7   :  { %v1119_v60 = vpop.eup %1118 }
 0x1c8   :  { %997 = vmatmul.mubr.msk.f32.vlgmr.msra.gmra.mxu1 %vm193_vm1, %v1119_v60  ;;  %v181_v60 = vadd.f32 %v888_v59, %v1379_v46 }
 0x1c9   :  { %1000 = vmatpush3.msra.mxu1 %v1298_v35  ;;  %1015 = vmatprep.mubr.msk.f32.mxu1 %vm1155_vm0, %v1154_v34 }
 0x1ca   :  { %1001 = vmatprep.subr.mxu1 %v1154_v34 }
 0x1cb   :  { %1002 = vmatpush3.msra.mxu1 %v1307_v36 }
 0x1cc   :  { %1003 = vmatprep.subr.mxu1 %v1154_v34 }
 0x1cd   :  { %1004 = vmatpush3.msra.mxu1 %v1312_v37 }
 0x1ce   :  { %1005 = vmatprep.subr.mxu1 %v1154_v34 }
 0x1cf   :  { %1006 = vmatpush3.msra.mxu1 %v1326_v40 }
 0x1d0   :  { %1007 = vmatprep.subr.mxu1 %v1154_v34 }
 0x1d1   :  { %1008 = vmatpush3.msra.mxu1 %v1335_v41 }
 0x1d2   :  { %1009 = vmatprep.subr.mxu1 %v1154_v34 }
 0x1d3   :  { %1010 = vmatpush3.msra.mxu1 %v1344_v42 }
 0x1d4   :  { %1011 = vmatprep.subr.mxu1 %v1154_v34 }
 0x1d5   :  { %1012 = vmatpush3.msra.mxu1 %v1353_v43 }
 0x1d6   :  { %1013 = vmatprep.subr.mxu1 %v1154_v34 }
 0x1d7   :  { %1014 = vmatpush3.msra.mxu1 %v1362_v44 }
 0x1d8   :  { %1037 = vmatprep.subr.mxu1 %v1154_v34 }
 0x288   :  { %v338_v5 = vpop.f32.mrf.mxu1 }
 0x289   :  { %v342_v6 = vadd.f32 %v338_v5, %v156_v4 }
 0x28a   :  { %v998_v7 = vpop.f32.mrf.mxu1 }
 0x28b   :  { %1120 = vtanh.f32 %v342_v6 }
 0x298   :  { %v1121_v8 = vpop.eup %1120 }
 0x299   :  { %1016 = vmatmul.mubr.msk.f32.vlgmr.msra.gmra.mxu1 %vm193_vm1, %v1121_v8 }
 0x29a   :  { %1038 = vmatpush3.msra.mxu1 %v1298_v35  ;;  %1053 = vmatprep.mubr.msk.f32.mxu1 %vm1155_vm0, %v1154_v34 }
 0x29b   :  { %1039 = vmatprep.subr.mxu1 %v1154_v34 }
 0x29c   :  { %1040 = vmatpush3.msra.mxu1 %v1307_v36 }
 0x29d   :  { %1041 = vmatprep.subr.mxu1 %v1154_v34 }
 0x29e   :  { %1042 = vmatpush3.msra.mxu1 %v1312_v37 }
 0x29f   :  { %1043 = vmatprep.subr.mxu1 %v1154_v34 }
 0x2a0   :  { %1044 = vmatpush3.msra.mxu1 %v1326_v40 }
 0x2a1   :  { %1045 = vmatprep.subr.mxu1 %v1154_v34 }
 0x2a2   :  { %1046 = vmatpush3.msra.mxu1 %v1335_v41 }
 0x2a3   :  { %1047 = vmatprep.subr.mxu1 %v1154_v34 }
 0x2a4   :  { %1048 = vmatpush3.msra.mxu1 %v1344_v42 }
 0x2a5   :  { %1049 = vmatprep.subr.mxu1 %v1154_v34 }
 0x2a6   :  { %1050 = vmatpush3.msra.mxu1 %v1353_v43 }
 0x2a7   :  { %1051 = vmatprep.subr.mxu1 %v1154_v34 }
 0x2a8   :  { %1052 = vmatpush3.msra.mxu1 %v1362_v44 }
 0x2a9   :  { %1075 = vmatprep.subr.mxu1 %v1154_v34 }
 0x359   :  { %v413_v19 = vpop.f32.mrf.mxu1 }
 0x35a   :  { %v417_v20 = vadd.f32 %v413_v19, %v161_v18 }
 0x35b   :  { %v1017_v21 = vpop.f32.mrf.mxu1 }
 0x35c   :  { %1122 = vtanh.f32 %v417_v20 }
 0x369   :  { %v1123_v22 = vpop.eup %1122 }
 0x36a   :  { %1035 = vmatmul.mubr.msk.f32.vlgmr.msra.gmra.mxu0 %vm193_vm1, %v1123_v22 }
 0x36b   :  { %1057 = vmatpush3.msra.mxu0 %v1298_v35  ;;  %1072 = vmatprep.mubr.msk.f32.mxu0 %vm1155_vm0, %v1154_v34 }
 0x36c   :  { %1058 = vmatprep.subr.mxu0 %v1154_v34 }
 0x36d   :  { %1059 = vmatpush3.msra.mxu0 %v1307_v36 }
 0x36e   :  { %1060 = vmatprep.subr.mxu0 %v1154_v34 }
 0x36f   :  { %1061 = vmatpush3.msra.mxu0 %v1312_v37 }
 0x370   :  { %1062 = vmatprep.subr.mxu0 %v1154_v34 }
 0x371   :  { %1063 = vmatpush3.msra.mxu0 %v1326_v40 }
 0x372   :  { %1064 = vmatprep.subr.mxu0 %v1154_v34 }
 0x373   :  { %1065 = vmatpush3.msra.mxu0 %v1335_v41 }
 0x374   :  { %1066 = vmatprep.subr.mxu0 %v1154_v34 }
 0x375   :  { %1067 = vmatpush3.msra.mxu0 %v1344_v42 }
 0x376   :  { %1068 = vmatprep.subr.mxu0 %v1154_v34 }
 0x377   :  { %1069 = vmatpush3.msra.mxu0 %v1353_v43 }
 0x378   :  { %1070 = vmatprep.subr.mxu0 %v1154_v34 }
 0x379   :  { %1071 = vmatpush3.msra.mxu0 %v1362_v44 }
 0x37a   :  { %1094 = vmatprep.subr.mxu0 %v1154_v34 }
 0x42a   :  { %v488_v39 = vpop.f32.mrf.mxu0 }
 0x42b   :  { %v492_v45 = vadd.f32 %v488_v39, %v166_v38 }
 0x42c   :  { %v1036_v47 = vpop.f32.mrf.mxu0 }
 0x42d   :  { %1124 = vtanh.f32 %v492_v45 }
 0x43a   :  { %v1125_v48 = vpop.eup %1124 }
 0x43b   :  { %1054 = vmatmul.mubr.msk.f32.vlgmr.msra.gmra.mxu1 %vm193_vm1, %v1125_v48 }
 0x43c   :  { %1076 = vmatpush3.msra.mxu1 %v1298_v35  ;;  %1091 = vmatprep.mubr.msk.f32.mxu1 %vm1155_vm0, %v1154_v34  ;;  %v171_v35 = vadd.f32 %v882_v27, %v1379_v46 }
 0x43d   :  { %1077 = vmatprep.subr.mxu1 %v1154_v34 }
 0x43e   :  { %1078 = vmatpush3.msra.mxu1 %v1307_v36 }
 0x43f   :  { %1079 = vmatprep.subr.mxu1 %v1154_v34 }
 0x440   :  { %1080 = vmatpush3.msra.mxu1 %v1312_v37 }
 0x441   :  { %1081 = vmatprep.subr.mxu1 %v1154_v34 }
 0x442   :  { %1082 = vmatpush3.msra.mxu1 %v1326_v40 }
 0x443   :  { %1083 = vmatprep.subr.mxu1 %v1154_v34 }
 0x444   :  { %1084 = vmatpush3.msra.mxu1 %v1335_v41  ;;  %v176_v41 = vadd.f32 %v885_v30, %v1379_v46 }
 0x445   :  { %1085 = vmatprep.subr.mxu1 %v1154_v34 }
 0x446   :  { %1086 = vmatpush3.msra.mxu1 %v1344_v42 }
 0x447   :  { %1087 = vmatprep.subr.mxu1 %v1154_v34 }
 0x448   :  { %1088 = vmatpush3.msra.mxu1 %v1353_v43 }
 0x449   :  { %1089 = vmatprep.subr.mxu1 %v1154_v34 }
 0x44a   :  { %1090 = vmatpush3.msra.mxu1 %v1362_v44  ;;  %v727_v44 = vld [vmem:[%s1570_s4 + $0x38] sm:$0xff]  ;;  %s1132_s4 = scalar_lea.vmem %s816_s26, 128 }
 0x44b   :  { %p1133_p0 = scmp.ne.s32.totalorder %s816_s26, %s1132_s4  ;;  %p1138_p2 = scmp.lt.s32.totalorder %s1132_s4, %s1132_s4 }
 0x44d   :  { %p1139_p3 = por %p1138_p2, %p1137_p1 }
 0x44f   :  { %p1140_p4 = pnand %p1139_p3, %p1133_p0 }
 0x4fb   :  { %v563_v36 = vpop.f32.mrf.mxu1 }
 0x4fc   :  { %v567_v37 = vadd.f32 %v563_v36, %v171_v35 }
 0x4fd   :  { %v1055_v40 = vpop.f32.mrf.mxu1 }
 0x4fe   :  { %1126 = vtanh.f32 %v567_v37 }
 0x50b   :  { %v1127_v49 = vpop.eup %1126 }
 0x50c   :  { %1073 = vmatmul.mubr.msk.f32.vlgmr.msra.gmra.mxu0 %vm193_vm1, %v1127_v49 }
 0x50d   :  { %1110 = vmatprep.mubr.msk.f32.mxu0 %vm1155_vm0, %v1154_v34  ;;  %1095 = vmatpush3.msra.mxu0 %v727_v44 }
 0x50e   :  { %1096 = vmatprep.subr.mxu0 %v1154_v34 }
 0x50f   :  { %1097 = vmatpush3.msra.mxu0 %v726_v52 }
 0x510   :  { %1098 = vmatprep.subr.mxu0 %v1154_v34 }
 0x511   :  { %1099 = vmatpush3.msra.mxu0 %v725_v53 }
 0x512   :  { %1100 = vmatprep.subr.mxu0 %v1154_v34 }
 0x513   :  { %1101 = vmatpush3.msra.mxu0 %v724_v54 }
 0x514   :  { %1102 = vmatprep.subr.mxu0 %v1154_v34 }
 0x515   :  { %1103 = vmatpush3.msra.mxu0 %v723_v55 }
 0x516   :  { %1104 = vmatprep.subr.mxu0 %v1154_v34 }
 0x517   :  { %1105 = vmatpush3.msra.mxu0 %v722_v56 }
 0x518   :  { %1106 = vmatprep.subr.mxu0 %v1154_v34 }
 0x519   :  { %1107 = vmatpush3.msra.mxu0 %v721_v57 }
 0x51a   :  { %1108 = vmatprep.subr.mxu0 %v1154_v34  ;;  %v831_v34 = vld [vmem:[%s1571_s5] ss:$0 sm:$0xff] }
 0x51b   :  { %1109 = vmatpush3.msra.mxu0 %v720_v58 }
 0x5cc   :  { %v638_v42 = vpop.f32.mrf.mxu0 }
 0x5cd   :  { %v642_v43 = vadd.f32 %v638_v42, %v176_v41 }
 0x5ce   :  { %v1074_v50 = vpop.f32.mrf.mxu0 }
 0x5cf   :  { %1128 = vtanh.f32 %v642_v43 }
 0x5dc   :  { %v1129_v51 = vpop.eup %1128 }
 0x5dd   :  { %1092 = vmatmul.mubr.msk.f32.vlgmr.msra.gmra.mxu1 %vm193_vm1, %v1129_v51 }
 0x69d   :  { %v713_v61 = vpop.f32.mrf.mxu1 }
 0x69e   :  { %v717_v62 = vadd.f32 %v713_v61, %v181_v60 }
 0x69f   :  { %v1093_v63 = vpop.f32.mrf.mxu1 }
 0x6a0   :  { %1130 = vtanh.f32 %v717_v62 }
 0x6ad   :  { %v1131_v0 = vpop.eup %1130 }
 0x6ae   :  { %v719_v1 = vmax.f32 %v1131_v0, 0.0 }
 0x6b0   :  { %1111 = vmatmul.mubr.msk.f32.vlgmr.msra.gmra.mxu0 %vm193_vm1, %v719_v1 }
 0x770   :  { %v804_v2 = vpop.f32.mrf.mxu0 }
 0x771   :  { %v805_v3 = vadd.f32 %v831_v34, %v804_v2 }
 0x772   :  { %v1112_v4 = vpop.f32.mrf.mxu0 }
 0x773   :  { %808 = vst [vmem:[#allocation2] sm:$0xff] %v805_v3 }
 0x774   :  { %1143 = shalt.err (!%p1140_p4)
}
 0x775   :  { %818 = dma.vmem_to_hbm [thread:$0]  %s816_s26, 128, %s1572_s6, [#allocation3]  }
 0x776   :  { %1152 = dma.done.wait [#allocation3], 128  }
 0x777   :  { %1153 = vsyncadd [#allocation3], 4294967168 }
 0x778   :  { %822 = vsyncpa [#allocation3], 1 }

</bundles_post_ra>
